<compile_context>
chip_gen: v6e
topology: v6e:2x2x1
jax: 0.10.0
libtpu: 0.0.40
codegen_flags: <defaults>
</compile_context>

<pallas_src>
import jax
import jax.numpy as jnp
from jax.experimental import pallas as pl
from jax.experimental.pallas import tpu as pltpu

_EPS = 1e-12                          # torch F.normalize default eps
_TARGET_BLOCK_BYTES = 4 * 1024 * 1024  # ~4 MiB per block: near HBM roofline


def _l2_normalize_kernel(x_ref, o_ref):
    x = x_ref[...]                                   # (TB, D), input dtype
    xf = x.astype(jnp.float32)                       # accumulate in f32
    sq_sum = jnp.sum(xf * xf, axis=-1, keepdims=True)        # (TB, 1) f32
    # max(sqrt(s), eps) == sqrt(max(s, eps^2))  ->  rsqrt (EUP) of clamped sum.
    inv = jax.lax.rsqrt(jnp.maximum(sq_sum, jnp.float32(_EPS * _EPS)))
    # Scale in f32 (full accuracy), single cast to the output dtype on store.
    o_ref[...] = (xf * inv).astype(o_ref.dtype)


def _round_up(a: int, m: int) -> int:
    return ((a + m - 1) // m) * m


def _vmem_budget_bytes() -> tuple[int, int]:
    """(pipeline-buffer budget, vmem_limit_bytes), generation aware."""
    try:
        cap = int(pltpu.get_tpu_info().vmem_capacity_bytes)
    except Exception:
        cap = 64 * 1024 * 1024        # conservative: assume v7x-sized VMEM
    # ~3/8 of physical VMEM for pipeline buffers, scoped limit at half:
    #   128 MiB (v5e/v6e) -> 48 MiB budget / 64 MiB limit
    #    64 MiB (v7x)     -> 24 MiB budget / 32 MiB limit
    return (cap * 3) // 8, cap // 2


def _pick_row_tile(batch: int, features: int, itemsize: int,
                   budget_bytes: int) -> int:
    per_row = features * itemsize
    # Native sublane packing: 8 rows f32, 16 rows bf16, 32 rows int8/fp8.
    sub = max(8, 32 // itemsize)

    # VMEM cost per block: 2x double-buffered input + 2x double-buffered output
    # (input dtype) + one possible f32 intermediate of the block.
    per_row_vmem = 4 * per_row + 4 * features
    budget_rows = budget_bytes // per_row_vmem
    if budget_rows < sub and batch > sub:
        raise ValueError(
            f"features={features} too large for a single {sub}-row block "
            f"within the VMEM budget; needs a D-tiled variant.")

    # Byte-based target block size (HBM streaming sweet spot).
    target_rows = max(1, _TARGET_BLOCK_BYTES // per_row)

    tb = min(budget_rows, target_rows)
    tb = max(sub, (tb // sub) * sub)

    # Megacore (v7x): when the batch is big enough, guarantee >= 2 grid steps
    # so the "parallel" axis shards across both TensorCores. Near-neutral on
    # single-TC chips (per-step overhead ~0.35 us).
    if batch > 2 * sub:
        half = _round_up(pl.cdiv(batch, 2), sub)
        tb = min(tb, half)

    if batch <= tb:
        return batch                  # single full-extent block (always legal)

    # Prefer an even number of grid steps (balances the two TCs on v7x).
    grid = pl.cdiv(batch, tb)
    if grid > 1 and grid % 2 == 1:
        tb_even = _round_up(pl.cdiv(batch, grid + 1), sub)
        if sub <= tb_even <= tb and pl.cdiv(batch, tb_even) % 2 == 0:
            tb = tb_even
    return tb


def embedding_head(x: jax.Array) -> jax.Array:
    """L2-normalize each row of a (batch, features) array (torch F.normalize)."""
    B, D = x.shape
    budget, vmem_limit = _vmem_budget_bytes()
    tb = _pick_row_tile(B, D, x.dtype.itemsize, budget)
    grid = (pl.cdiv(B, tb),)
    return pl.pallas_call(
        _l2_normalize_kernel,
        out_shape=jax.ShapeDtypeStruct((B, D), x.dtype),
        grid_spec=pltpu.PrefetchScalarGridSpec(
            num_scalar_prefetch=0,
            grid=grid,
            # Keep D (lane axis) whole and lane-dense; tile only the batch.
            in_specs=[pl.BlockSpec((tb, D), lambda i: (i, 0))],
            out_specs=pl.BlockSpec((tb, D), lambda i: (i, 0)),
        ),
        compiler_params=pltpu.CompilerParams(
            dimension_semantics=("parallel",),          # megacore on v7x
            vmem_limit_bytes=vmem_limit,
        ),
    )(x)


def _ref_normalize(x):
    xf = x.astype(jnp.float32)
    norm = jnp.sqrt(jnp.sum(xf * xf, axis=1, keepdims=True))
    return (xf / jnp.maximum(norm, _EPS)).astype(x.dtype)


if __name__ == "__main__":
    # EmbeddingHead has no parameters; just build deterministic inputs.
    # D is a multiple of 128 (lane-dense stores); B big enough to exercise
    # the multi-block (megacore-splitting) path.
    key = jax.random.PRNGKey(0)
    B, D = 32, 256
    x = jax.random.normal(key, (B, D), dtype=jnp.float32)

    out = embedding_head(x)
    out = jax.block_until_ready(out)
    assert out.shape == x.shape and out.dtype == x.dtype
    assert jnp.allclose(out, _ref_normalize(x), atol=1e-5, rtol=1e-5)

    # Reduced-precision path (scale computed in f32, cast once on store).
    x_bf16 = x.astype(jnp.bfloat16)
    out_bf16 = jax.block_until_ready(embedding_head(x_bf16))
    assert out_bf16.shape == x.shape and out_bf16.dtype == jnp.bfloat16
    assert jnp.allclose(out_bf16.astype(jnp.float32),
                        _ref_normalize(x_bf16).astype(jnp.float32),
                        atol=1e-2, rtol=1e-2)

    # Small / ragged batch path (single full-extent block).
    x_small = jax.random.normal(jax.random.PRNGKey(1), (3, 256), jnp.float32)
    out_small = jax.block_until_ready(embedding_head(x_small))
    assert jnp.allclose(out_small, _ref_normalize(x_small), atol=1e-5, rtol=1e-5)

    print("KERNEL_OK")
</pallas_src>

<mosaic_0001>
module attributes {stable_mosaic.version = 11 : i64} {
  func.func @_l2_normalize_kernel(%arg0: i32, %arg1: memref<16x256xf32, #tpu.memory_space<vmem>>, %arg2: memref<16x256xf32, #tpu.memory_space<vmem>>) attributes {dimension_semantics = [#tpu.dimension_semantics<parallel>], iteration_bounds = array<i64: 2>, scalar_prefetch = 0 : i64, scratch_operands = 0 : i64, tpu.core_type = #tpu.core_type<tc>, window_params = [{transform_indices = @transform_0, window_bounds = array<i64: 16, 256>}, {transform_indices = @transform_1, window_bounds = array<i64: 16, 256>}]} {
    %c0 = arith.constant 0 : index
    %c0_0 = arith.constant 0 : index
    %0 = vector.load %arg1[%c0, %c0_0] : memref<16x256xf32, #tpu.memory_space<vmem>>, vector<16x256xf32>
    %1 = arith.mulf %0, %0 : vector<16x256xf32>
    %cst = arith.constant dense<0.000000e+00> : vector<16xf32>
    %2 = vector.multi_reduction <add>, %1, %cst [1] : vector<16x256xf32> to vector<16xf32>
    %3 = vector.shape_cast %2 : vector<16xf32> to vector<16x1xf32>
    %cst_1 = arith.constant 1.000000e-24 : f32
    %4 = vector.broadcast %cst_1 : f32 to vector<16x1xf32>
    %5 = arith.maximumf %3, %4 : vector<16x1xf32>
    %6 = math.rsqrt %5 : vector<16x1xf32>
    %7 = vector.broadcast %6 : vector<16x1xf32> to vector<16x256xf32>
    %8 = arith.mulf %0, %7 : vector<16x256xf32>
    %c0_2 = arith.constant 0 : index
    %c0_3 = arith.constant 0 : index
    %9 = vector.load %arg2[%c0_2, %c0_3] : memref<16x256xf32, #tpu.memory_space<vmem>>, vector<16x256xf32>
    tpu.vector_store %arg2[%c0_2, %c0_3], %8 {strides = array<i32>} : memref<16x256xf32, #tpu.memory_space<vmem>>, vector<16x256xf32>,
    return
  }
  func.func @transform_0(%arg0: i32) -> (i32, i32) {
    %c0_i32 = arith.constant 0 : i32
    %c0_i32_0 = arith.constant 0 : i32
    return %arg0, %c0_i32 : i32, i32
  }
  func.func @transform_1(%arg0: i32) -> (i32, i32) {
    %c0_i32 = arith.constant 0 : i32
    %c0_i32_0 = arith.constant 0 : i32
    return %arg0, %c0_i32 : i32, i32
  }
}

</mosaic_0001>

<bundles_post_ra>
// kernel: tpu_custom_call.1
= control target key start
LH: loop header
LB: loop body
LE: loop exit
PB: predicated region body
PF: predicated region fallthrough
CT: control target
= control target key end

     0   :  { %6 = vsyncpa [#allocation3], 0  ;;  %s590_s0 = inlined_call_operand.hbm [shape: f32[32,256], index: 0, kind: input, shape index: {}]   ;;  %s591_s1 = inlined_call_operand.hbm [shape: f32[32,256], index: 1, kind: output, shape index: {}]  }
   0x1   :  { %8 = vsyncpa [#allocation3 + $0x1], 0 }
   0x2   :  { %9 = vsyncpa [#allocation4], 0 }
   0x3   :  { %11 = vsyncpa [#allocation4 + $0x1], 0  ;;  %s436_s6 = smov 0   ;;  %s438_s7 = smov 0  }
   0x4   :  { %s440_s8 = smov 0   ;;  %s442_s9 = smov 0  }
   0x5 LB: > { %s457_s10 = sadd.s32 4294967295, %s418_s9   ;;  %s252_s11 = sadd.s32 4294967294, %s418_s9   ;;  %s418_s9 = sphi %s442_s9, %s606_s9   ;;  %s414_s8 = sphi %s440_s8, %s605_s8   ;;  %s410_s7 = sphi %s438_s7, %s604_s7   ;;  %s406_s6 = sphi %s436_s6, %s603_s6  }
   0x6   : > { %s461_s12 = sadd.s32 1, %s418_s9   ;;  %s24_s13 = sadd.s32 1, %s414_s8 }
   0x7   : > { %s21_s14 = ssub.s32 %s418_s9, %s461_s12  ;;  %p31_p0 = scmp.ne.s32.totalorder %s414_s8, %s410_s7 }
   0x8   : > { %p22_p1 = scmp.eq.s32.totalorder %s21_s14, 0  ;;  %p32_p2 = scmp.eq.s32.totalorder %s418_s9, 0 }
   0x9   : > { %p37_p3 = scmp.ne.s32.totalorder %s410_s7, %s406_s6  ;;  %p38_p4 = scmp.eq.s32.totalorder %s457_s10, 0 }
   0xa   : > { %s473_s15 = scalar_select %p22_p1, %s414_s8, %s24_s13  }
   0xb   : > { %p475_p5 = por %p32_p2, %p31_p0  ;;  %p479_p6 = por %p38_p4, %p37_p3 }
   0xc   : > { %p61_p7 = scmp.eq.s32.totalorder %s457_s10, 1  ;;  %p67_p8 = scmp.eq.s32.totalorder %s252_s11, 1 }
   0xd   : > { %s595_s17 = scalar_select %p479_p6, 1, 0 }
   0xe   : > { %p284_p10 = scmp.lt.s32.totalorder %s418_s9, 2  ;;  %p486_p11 = por %p61_p7, %p31_p0 }
   0xf   : > { %p490_p12 = por %p67_p8, %p37_p3  ;;  %s87_s20 = sand.u32 1, %s414_s8  }
  0x10   : > { %s596_s18 = scalar_select %p486_p11, 1, 0 }
  0x11   : > { %s597_s19 = scalar_select %p490_p12, 1, 0 }
  0x12   : > { %s269_s21 = sshll.u32 %s418_s9, 9  ;;  %s255_s22 = sshll.u32 %s87_s20, 5 }
  0x13   : > { %s499_s25 = scalar_lea.hbm %s590_s0, %s269_s21  ;;  %s91_s26 = scalar_lea.vmem [#allocation2], %s255_s22 }
  0x14   : > { %s99_s27 = sshll.u32 %s91_s26, 4  ;;  %p503_p13 = pnand %p284_p10, %p475_p5  ;;  %s507_s27 = int_to_ptr.vmem [resolvable:$true] %s99_s27 }
  0x15   : > { %s509_s29 = scalar_lea.sflag [#allocation3], %s87_s20  ;;  %s326_s30 = scalar_lea.hbm %s499_s25, 512 }
  0x16   : > { %p327_p0 = scmp.ne.s32.totalorder %s499_s25, %s326_s30  ;;  %p328_p1 = pneg %p503_p13 }
  0x17   : > { %s331_s4 = scalar_lea.hbm %s590_s0, 1024  ;;  %p332_p4 = scmp.lt.s32.totalorder %s499_s25, %s590_s0 }
  0x18   : > { %p329_p2 = pnand %p328_p1, %p327_p0  ;;  %p333_p5 = scmp.lt.s32.totalorder %s331_s4, %s326_s30 }
  0x1a   : > { %p330_p3 = pneg %p329_p2  ;;  %p334_p7 = por %p333_p5, %p332_p4 }
  0x1c   : > { %p335_p8 = pnand %p334_p7, %p330_p3 }
  0x1e   : > { %338 = shalt.err (!%p335_p8)
}
  0x1f   : > { %s339_s13 = scalar_lea.vmem %s507_s27, 512  ;;  %s420_s14 = smov [#allocation2]  }
  0x20   : > { %p340_p10 = scmp.ne.s32.totalorder %s507_s27, %s339_s13  ;;  %s344_s16 = sshll.u32 %s420_s14, 4  ;;  %s345_s16 = int_to_ptr.vmem [resolvable:$false] %s344_s16 }
  0x21   : > { %s346_s20 = scalar_lea.vmem %s345_s16, 1024  ;;  %p347_p2 = scmp.lt.s32.totalorder %s507_s27, %s345_s16 }
  0x22   : > { %p342_p9 = pnand %p340_p10, %p328_p1  ;;  %p348_p12 = scmp.lt.s32.totalorder %s346_s20, %s339_s13 }
  0x24   : > { %p343_p0 = pneg %p342_p9  ;;  %p349_p11 = por %p348_p12, %p347_p2 }
  0x26   : > { %p350_p6 = pnand %p349_p11, %p343_p0 }
  0x28   : > { %353 = shalt.err (!%p350_p6)
}
  0x29   : > { %s421_s21 = smov 256   ;;  %s422_s22 = smov 16  }
  0x2a   : > { %279 = dma.hbm_to_vmem [thread:$0]  (!%p503_p13), %s499_s25, 512, %s507_s27, %s509_s29, %s421_s21, %s421_s21, %s422_s22  }
  0x2b   : > { %p259_p9 = scmp.ge.s32.totalorder %s418_s9, 1  ;;  %p107_p1 = scmp.lt.s32.totalorder %s418_s9, 3 }
  0x2d   : > { %p108_p3 = pnand %p259_p9, %p107_p1 }
  0x2e   : > { %s533_s23 = sand.u32 (!%p108_p3), 1, %s410_s7   ;;  %p599_p6 = scmp.ne.s32.totalorder (!%p108_p3), %s595_s17, 0 }
  0x2f   : > { %111 = sbr.rel (%p108_p3) target bundleno = 232 (0xe8), region = 24  ;;  %s260_s24 = sshll.u32 (!%p108_p3), %s533_s23, 5 }
  0x30   : > { %s114_s26 = scalar_lea.sflag (!%p108_p3), [#allocation3], %s533_s23  ;;  %s117_s30 = scalar_lea.vmem (!%p108_p3), [#allocation2], %s260_s24 }
  0x34   : > { %397 = dma.done.wait (%p599_p6), %s114_s26, 512  }
  0x35   : > { %399 = vsyncadd (%p599_p6), %s114_s26, 4294966784  ;;  %v138_v0 = vld [vmem:[%s117_s30] sm:$0xff]  ;;  %v139_v1 = vld [vmem:[%s117_s30 + $0x8] sm:$0xff]  ;;  %s271_s17 = sshll.u32 %s457_s10, 9  ;;  %s135_s25 = scalar_lea.vmem [#allocation5], %s260_s24 }
  0x36   : > { %v140_v2 = vld [vmem:[%s117_s30 + $0x10] sm:$0xff]  ;;  %v142_v3 = vmul.f32 %v138_v0, %v138_v0  ;;  %v143_v4 = vmul.f32 %v139_v1, %v139_v1  ;;  %v141_v5 = vld [vmem:[%s117_s30 + $0x18] sm:$0xff]  ;;  %s179_s27 = sshll.u32 %s135_s25, 4  ;;  %s545_s2 = scalar_lea.hbm %s591_s1, %s271_s17  ;;  %s547_s27 = int_to_ptr.vmem [resolvable:$true] %s179_s27 }
  0x37   : > { %v144_v6 = vmul.f32 %v140_v2, %v140_v2  ;;  %v145_v7 = vmul.f32 %v141_v5, %v141_v5  ;;  %s165_s10 = scalar_lea.sflag [#allocation4], %s533_s23  ;;  %s354_s3 = scalar_lea.vmem %s547_s27, 512 }
  0x38   : > { %v146_v8 = vadd.f32 %v143_v4, %v142_v3  ;;  %p355_p11 = scmp.ne.s32.totalorder %s547_s27, %s354_s3  ;;  %p600_p12 = scmp.ne.s32.totalorder %s596_s18, 0 }
  0x39   : > { %v149_v9 = vadd.f32 %v145_v7, %v144_v6  ;;  %s423_s4 = smov [#allocation5]  }
  0x3a   : > { %147 = vadd.xlane.f32.xlu0 %v146_v8  ;;  %p356_p13 = pnand %p355_p11, %p600_p12  ;;  %s358_s5 = sshll.u32 %s423_s4, 4  ;;  %s359_s5 = int_to_ptr.vmem [resolvable:$false] %s358_s5 }
  0x3b   : > { %s360_s11 = scalar_lea.vmem %s359_s5, 1024  ;;  %p361_p5 = scmp.lt.s32.totalorder %s547_s27, %s359_s5 }
  0x3c   : > { %p357_p4 = pneg %p356_p13  ;;  %p362_p7 = scmp.lt.s32.totalorder %s360_s11, %s354_s3 }
  0x3e   : > { %150 = vadd.xlane.f32.xlu0 %v149_v9  ;;  %p363_p8 = por %p362_p7, %p361_p5 }
  0x40   : > { %p364_p10 = pnand %p363_p8, %p357_p4 }
  0xc3   : > { %v148_v10 = vpop.xlane.xlu0 %147 }
  0xc4   : > { %v152_v11 = vmax.f32 %v148_v10, 1e-24 }
  0xc6   : > { %322 = vrsqrt.f32 %v152_v11 }
  0xc7   : > { %v151_v12 = vpop.xlane.xlu0 %150 }
  0xc8   : > { %v153_v13 = vmax.f32 %v151_v12, 1e-24 }
  0xca   : > { %324 = vrsqrt.f32 %v153_v13 }
  0xd3   : > { %v323_v14 = vpop.eup %322 }
  0xd4   : > { %v156_v15 = vmul.f32 %v323_v14, %v138_v0  ;;  %v157_v16 = vmul.f32 %v323_v14, %v139_v1 }
  0xd6   : > { %160 = vst [vmem:[%s135_s25] sm:$0xff] %v156_v15  ;;  %161 = vst [vmem:[%s135_s25 + $0x8] sm:$0xff] %v157_v16 }
  0xd7   : > { %v325_v17 = vpop.eup %324 }
  0xd8   : > { %v158_v18 = vmul.f32 %v325_v17, %v140_v2  ;;  %v159_v19 = vmul.f32 %v325_v17, %v141_v5 }
  0xda   : > { %162 = vst [vmem:[%s135_s25 + $0x10] sm:$0xff] %v158_v18  ;;  %163 = vst [vmem:[%s135_s25 + $0x18] sm:$0xff] %v159_v19 }
  0xdb   : > { %367 = shalt.err (!%p364_p10)
}
  0xdc   : > { %s368_s13 = scalar_lea.hbm %s545_s2, 512  ;;  %s372_s20 = scalar_lea.hbm %s591_s1, 1024 }
  0xdd   : > { %p369_p0 = scmp.ne.s32.totalorder %s545_s2, %s368_s13  ;;  %p373_p1 = scmp.lt.s32.totalorder %s545_s2, %s591_s1 }
  0xde   : > { %p374_p3 = scmp.lt.s32.totalorder %s372_s20, %s368_s13 }
  0xdf   : > { %p370_p2 = pnand %p369_p0, %p600_p12 }
  0xe0   : > { %p375_p6 = por %p374_p3, %p373_p1 }
  0xe1   : > { %p371_p9 = pneg %p370_p2 }
  0xe3   : > { %p376_p11 = pnand %p375_p6, %p371_p9 }
  0xe5   : > { %379 = shalt.err (!%p376_p11)
}
  0xe6   : > { %s424_s24 = smov 256   ;;  %s425_s26 = smov 16  }
  0xe7   : > { %274 = dma.vmem_to_hbm [thread:$0]  (%p600_p12), %s547_s27, 512, %s545_s2, %s165_s10, %s424_s24, %s424_s24, %s425_s26  }
  0xe8 PF: > { %s194_s30 = sand.u32 1, %s406_s6   ;;  %p601_p13 = scmp.ne.s32.totalorder %s597_s19, 0 }
  0xe9   : > { %p602_p4 = scmp.ge.s32.totalorder %s418_s9, 2  ;;  %s195_s17 = scalar_lea.sflag [#allocation4], %s194_s30 }
  0xeb   : > { %p281_p5 = pnand %p602_p4, %p601_p13 }
  0xed   : > { %p282_p7 = pneg %p281_p5 }
  0xef   : > { %401 = dma.done.wait (%p282_p7), %s195_s17, 512  }
  0xf0   : > { %403 = vsyncadd (%p282_p7), %s195_s17, 4294966784  ;;  %p14_p8 = scmp.ge.s32.totalorder %s461_s12, 4   ;;  %s603_s6 = smov %s410_s7 }
  0xf1   : > { %s604_s7 = smov %s414_s8  ;;  %s605_s8 = smov %s473_s15 }
  0xf2   : > { %s606_s9 = smov %s461_s12  ;;  %16 = sbr.rel (!%p14_p8) target bundleno = 5 (0x5), region = 69 }
  0xf7   :  { %200 = vsyncpa [#allocation3], 1 }
  0xf8   :  { %202 = vsyncpa [#allocation3 + $0x1], 1 }
  0xf9   :  { %203 = vsyncpa [#allocation4], 1 }
  0xfa   :  { %205 = vsyncpa [#allocation4 + $0x1], 1 }

</bundles_post_ra>
